<compile_context>
chip_gen: v5e
topology: v5e:2x2
jax: 0.10.0
libtpu: 0.0.40
codegen_flags: <defaults>
</compile_context>

<pallas_src>
import jax
import jax.numpy as jnp
from jax.experimental import pallas as pl
from jax.experimental.pallas import tpu as pltpu

# NOTE: deepul's GAN MLP uses LeakyReLU with negative_slope=0.2 (standard GAN
# discriminator choice); set to 0.01 if your MLP uses the raw nn.LeakyReLU()
# default.
LEAKY_SLOPE = 0.2

# Conservative per-kernel VMEM budget: fits under v7x's 64 MiB physical VMEM
# and raises the scoped defaults (16 MiB on v5e, 32 MiB on v6e/v7x).
_VMEM_BUDGET_BYTES = 48 * 1024 * 1024


def _round_up(v: int, m: int) -> int:
    return ((v + m - 1) // m) * m


def _make_mlp_kernel(num_hidden: int, neg_slope: float):
    """Fused-MLP kernel.  Ref order:
       (x, w0, b0, ..., w_{nh-1}, b_{nh-1}, w_last_row, b_last, out)
    x: f32 [bt, in]; w_i: bf16 [in, hid]; b_i: f32 [1, hid];
    w_last_row: f32 [1, hid]; b_last: f32 [1, 1]; out: f32 [bt, 1].
    """

    def kernel(*refs):
        x_ref = refs[0]
        o_ref = refs[-1]
        p = refs[1:-1]

        # x stays in the caller's dtype through HBM/VMEM; the bf16 cast for
        # the MXU happens here (VPU pack, hidden under the matmul).
        h = x_ref[...]
        for layer in range(num_hidden):
            w = p[2 * layer][...]                          # bf16 [in, hid]
            b = p[2 * layer + 1][...]                      # f32  [1, hid]
            acc = jnp.dot(h.astype(jnp.bfloat16), w,
                          preferred_element_type=jnp.float32) + b
            h = jnp.where(acc > 0, acc, neg_slope * acc)   # LeakyReLU, f32 VPU

        # Final (hid -> 1) layer: VPU multiply + XLU cross-lane reduction;
        # avoids an N=1 MXU pass.
        w_row = p[-2][...]                                 # f32 [1, hid]
        b_last = p[-1][...]                                # f32 [1, 1]
        logits = jnp.sum(h.astype(jnp.float32) * w_row, axis=-1,
                         keepdims=True) + b_last           # [bt, 1]
        o_ref[...] = jax.nn.sigmoid(logits).astype(o_ref.dtype)

    return kernel


def prepare_discriminator_params(params):
    """One-time parameter prep (hoisted out of the hot path).

    params: list of (W [in, out], b) pairs, last layer out == 1.
    Returns the flat list fed to the kernel: hidden W in bf16, biases f32
    [1, out], final W transposed to an f32 [1, hidden] row, final bias
    f32 [1, 1].
    """
    assert len(params) >= 1
    flat = []
    for (w, b) in params[:-1]:
        flat.append(jnp.asarray(w, jnp.bfloat16))
        flat.append(jnp.asarray(b, jnp.float32).reshape(1, -1))
    w_last, b_last = params[-1]
    flat.append(jnp.asarray(w_last, jnp.float32).T.reshape(1, -1))
    flat.append(jnp.asarray(b_last, jnp.float32).reshape(1, 1))
    return flat


def _vmem_bytes_estimate(batch_tile, input_dim, prepared_params):
    x_bytes = 2 * batch_tile * input_dim * 4            # double-buffered f32 x tile
    out_bytes = 2 * batch_tile * 4                      # double-buffered output column
    param_bytes = sum(int(p.size) * p.dtype.itemsize for p in prepared_params)
    widest = max([input_dim] + [int(p.shape[-1]) for p in prepared_params])
    work_bytes = 3 * batch_tile * widest * 4            # f32 intermediates (acc/h/where)
    return x_bytes + out_bytes + param_bytes + work_bytes


def discriminator_forward(x, prepared_params, *, batch_tile=None,
                          leaky_slope=LEAKY_SLOPE):
    """Discriminator forward pass as a single fused Pallas kernel.

    x:               [B, input_dim] float32 (bf16 cast happens in-kernel)
    prepared_params: output of prepare_discriminator_params(params)
    returns:         [B] float32 probabilities (== self.net(x).squeeze(-1))
    """
    assert x.ndim == 2
    B, input_dim = x.shape
    n_layers = len(prepared_params) // 2
    num_hidden = n_layers - 1

    # Adaptive batch tile: multiple of 8 (f32 sublane), capped at 512 so
    # realistic batches give >= 2 grid steps and the per-step VMEM footprint
    # stays small; shrunk further if the VMEM budget would be exceeded.
    if batch_tile is None:
        batch_tile = min(512, _round_up(B, 8))
    batch_tile = max(8, _round_up(batch_tile, 8))
    while (batch_tile > 128 and
           _vmem_bytes_estimate(batch_tile, input_dim, prepared_params)
           > _VMEM_BUDGET_BYTES):
        batch_tile = _round_up(batch_tile // 2, 8)

    num_tiles = pl.cdiv(B, batch_tile)   # ragged last block handled by Pallas

    kernel = _make_mlp_kernel(num_hidden, leaky_slope)

    x_spec = pl.BlockSpec((batch_tile, input_dim), lambda i: (i, 0))
    out_spec = pl.BlockSpec((batch_tile, 1), lambda i: (i, 0))
    out_shape = jax.ShapeDtypeStruct((B, 1), jnp.float32)
    compiler_params = pltpu.CompilerParams(
        dimension_semantics=("parallel",),       # v7x: shards tiles over 2 TCs
        vmem_limit_bytes=_VMEM_BUDGET_BYTES,
    )

    def _param_specs(single_buffer):
        kwargs = {"pipeline_mode": pl.Buffered(1)} if single_buffer else {}
        # Constant index_map -> weights/biases are effectively resident in
        # VMEM across the whole grid (never re-DMA'd).
        return [pl.BlockSpec(p.shape, lambda i: (0, 0), **kwargs)
                for p in prepared_params]

    def _run(single_buffer):
        return pl.pallas_call(
            kernel,
            out_shape=out_shape,
            grid=(num_tiles,),
            in_specs=[x_spec] + _param_specs(single_buffer),
            out_specs=out_spec,
            compiler_params=compiler_params,
        )(x, *prepared_params)

    try:
        out = _run(single_buffer=True)
    except Exception:
        # Fallback if this jax build rejects pipeline_mode=pl.Buffered(1).
        out = _run(single_buffer=False)

    return out[:, 0]


def init_discriminator_params(key, input_dim, n_hidden, hidden_size):
    """Deterministic init for the MLP [input_dim] + [hidden_size]*n_hidden + [1]."""
    dims = [input_dim] + [hidden_size] * n_hidden + [1]
    params = []
    for d_in, d_out in zip(dims[:-1], dims[1:]):
        key, wk, bk = jax.random.split(key, 3)
        scale = 1.0 / jnp.sqrt(jnp.float32(d_in))
        w = jax.random.uniform(wk, (d_in, d_out), jnp.float32, -scale, scale)
        b = jax.random.uniform(bk, (1, d_out), jnp.float32, -scale, scale)
        params.append((w, b))
    return params


if __name__ == "__main__":
    # Small shapes consistent with Discriminator(input_dim, n_hidden, hidden_size)
    batch = 8
    input_dim = 16
    n_hidden = 2
    hidden_size = 32

    key = jax.random.PRNGKey(0)
    key, xk = jax.random.split(key)
    x = jax.random.normal(xk, (batch, input_dim), jnp.float32)
    params = init_discriminator_params(key, input_dim, n_hidden, hidden_size)
    prepared = prepare_discriminator_params(params)   # one-time cast/transpose

    out = discriminator_forward(x, prepared)
    out = jax.block_until_ready(out)

    # Pure-JAX reference with the same precision recipe (bf16 matmul inputs,
    # f32 accumulation / elementwise, f32 final layer).
    h = x
    for (w, b) in params[:-1]:
        acc = jnp.dot(h.astype(jnp.bfloat16), w.astype(jnp.bfloat16),
                      preferred_element_type=jnp.float32) + b
        h = jnp.where(acc > 0, acc, LEAKY_SLOPE * acc)
    w_last, b_last = params[-1]
    logits = h @ w_last + b_last
    ref = jax.nn.sigmoid(logits)[:, 0]

    assert out.shape == (batch,)
    assert jnp.allclose(out, ref, atol=1e-3, rtol=1e-3), (
        f"max abs err {jnp.max(jnp.abs(out - ref))}")

    print("KERNEL_OK")
</pallas_src>

<mosaic_0001>
module attributes {stable_mosaic.version = 11 : i64} {
  func.func @kernel(%arg0: i32, %arg1: memref<8x16xf32, #tpu.memory_space<vmem>>, %arg2: memref<16x32xbf16, #tpu.memory_space<vmem>>, %arg3: memref<1x32xf32, #tpu.memory_space<vmem>>, %arg4: memref<32x32xbf16, #tpu.memory_space<vmem>>, %arg5: memref<1x32xf32, #tpu.memory_space<vmem>>, %arg6: memref<1x32xf32, #tpu.memory_space<vmem>>, %arg7: memref<1x1xf32, #tpu.memory_space<vmem>>, %arg8: memref<8x1xf32, #tpu.memory_space<vmem>>) attributes {dimension_semantics = [#tpu.dimension_semantics<parallel>], iteration_bounds = array<i64: 1>, scalar_prefetch = 0 : i64, scratch_operands = 0 : i64, tpu.core_type = #tpu.core_type<tc>, window_params = [{transform_indices = @transform_0, window_bounds = array<i64: 8, 16>}, {pipeline_mode = #tpu.pipeline_mode<synchronous>, transform_indices = @transform_1, window_bounds = array<i64: 16, 32>}, {pipeline_mode = #tpu.pipeline_mode<synchronous>, transform_indices = @transform_2, window_bounds = array<i64: 1, 32>}, {pipeline_mode = #tpu.pipeline_mode<synchronous>, transform_indices = @transform_3, window_bounds = array<i64: 32, 32>}, {pipeline_mode = #tpu.pipeline_mode<synchronous>, transform_indices = @transform_4, window_bounds = array<i64: 1, 32>}, {pipeline_mode = #tpu.pipeline_mode<synchronous>, transform_indices = @transform_5, window_bounds = array<i64: 1, 32>}, {pipeline_mode = #tpu.pipeline_mode<synchronous>, transform_indices = @transform_6, window_bounds = array<i64: 1, 1>}, {transform_indices = @transform_7, window_bounds = array<i64: 8, 1>}]} {
    %c0 = arith.constant 0 : index
    %c0_0 = arith.constant 0 : index
    %0 = vector.load %arg1[%c0, %c0_0] : memref<8x16xf32, #tpu.memory_space<vmem>>, vector<8x16xf32>
    %c0_1 = arith.constant 0 : index
    %c0_2 = arith.constant 0 : index
    %1 = vector.load %arg2[%c0_1, %c0_2] : memref<16x32xbf16, #tpu.memory_space<vmem>>, vector<16x32xbf16>
    %c0_3 = arith.constant 0 : index
    %c0_4 = arith.constant 0 : index
    %2 = vector.load %arg3[%c0_3, %c0_4] : memref<1x32xf32, #tpu.memory_space<vmem>>, vector<1x32xf32>
    %3 = arith.truncf %0 : vector<8x16xf32> to vector<8x16xbf16>
    %cst = arith.constant dense<0.000000e+00> : vector<8x32xf32>
    %4 = tpu.matmul %3, %1, %cst {dimension_numbers = #tpu.dot_dimension_numbers<[1], [0], [0], [1], [0, 0, 1, 1], [], []>} : vector<8x16xbf16>, vector<16x32xbf16>, vector<8x32xf32> -> vector<8x32xf32>
    %5 = vector.broadcast %2 : vector<1x32xf32> to vector<8x32xf32>
    %6 = arith.addf %4, %5 : vector<8x32xf32>
    %cst_5 = arith.constant 0.000000e+00 : f32
    %7 = vector.broadcast %cst_5 : f32 to vector<8x32xf32>
    %8 = arith.cmpf ogt, %6, %7 : vector<8x32xf32>
    %cst_6 = arith.constant 2.000000e-01 : f32
    %9 = vector.broadcast %cst_6 : f32 to vector<8x32xf32>
    %10 = arith.mulf %9, %6 : vector<8x32xf32>
    %11 = arith.select %8, %6, %10 : vector<8x32xi1>, vector<8x32xf32>
    %c0_7 = arith.constant 0 : index
    %c0_8 = arith.constant 0 : index
    %12 = vector.load %arg4[%c0_7, %c0_8] : memref<32x32xbf16, #tpu.memory_space<vmem>>, vector<32x32xbf16>
    %c0_9 = arith.constant 0 : index
    %c0_10 = arith.constant 0 : index
    %13 = vector.load %arg5[%c0_9, %c0_10] : memref<1x32xf32, #tpu.memory_space<vmem>>, vector<1x32xf32>
    %14 = arith.truncf %11 : vector<8x32xf32> to vector<8x32xbf16>
    %cst_11 = arith.constant dense<0.000000e+00> : vector<8x32xf32>
    %15 = tpu.matmul %14, %12, %cst_11 {dimension_numbers = #tpu.dot_dimension_numbers<[1], [0], [0], [1], [0, 0, 1, 1], [], []>} : vector<8x32xbf16>, vector<32x32xbf16>, vector<8x32xf32> -> vector<8x32xf32>
    %16 = vector.broadcast %13 : vector<1x32xf32> to vector<8x32xf32>
    %17 = arith.addf %15, %16 : vector<8x32xf32>
    %cst_12 = arith.constant 0.000000e+00 : f32
    %18 = vector.broadcast %cst_12 : f32 to vector<8x32xf32>
    %19 = arith.cmpf ogt, %17, %18 : vector<8x32xf32>
    %cst_13 = arith.constant 2.000000e-01 : f32
    %20 = vector.broadcast %cst_13 : f32 to vector<8x32xf32>
    %21 = arith.mulf %20, %17 : vector<8x32xf32>
    %22 = arith.select %19, %17, %21 : vector<8x32xi1>, vector<8x32xf32>
    %c0_14 = arith.constant 0 : index
    %c0_15 = arith.constant 0 : index
    %23 = vector.load %arg6[%c0_14, %c0_15] : memref<1x32xf32, #tpu.memory_space<vmem>>, vector<1x32xf32>
    %c0_16 = arith.constant 0 : index
    %c0_17 = arith.constant 0 : index
    %24 = vector.load %arg7[%c0_16, %c0_17] : memref<1x1xf32, #tpu.memory_space<vmem>>, vector<1x1xf32>
    %25 = vector.broadcast %23 : vector<1x32xf32> to vector<8x32xf32>
    %26 = arith.mulf %22, %25 : vector<8x32xf32>
    %cst_18 = arith.constant dense<0.000000e+00> : vector<8xf32>
    %27 = vector.multi_reduction <add>, %26, %cst_18 [1] : vector<8x32xf32> to vector<8xf32>
    %28 = vector.shape_cast %27 : vector<8xf32> to vector<8x1xf32>
    %29 = vector.broadcast %24 : vector<1x1xf32> to vector<8x1xf32>
    %30 = arith.addf %28, %29 : vector<8x1xf32>
    %31 = arith.negf %30 : vector<8x1xf32>
    %32 = math.exp %31 : vector<8x1xf32>
    %cst_19 = arith.constant 1.000000e+00 : f32
    %33 = vector.broadcast %cst_19 : f32 to vector<8x1xf32>
    %34 = arith.addf %33, %32 : vector<8x1xf32>
    %35 = arith.divf %33, %34 : vector<8x1xf32>
    %c0_20 = arith.constant 0 : index
    %c0_21 = arith.constant 0 : index
    %36 = vector.load %arg8[%c0_20, %c0_21] : memref<8x1xf32, #tpu.memory_space<vmem>>, vector<8x1xf32>
    tpu.vector_store %arg8[%c0_20, %c0_21], %35 {strides = array<i32>} : memref<8x1xf32, #tpu.memory_space<vmem>>, vector<8x1xf32>,
    return
  }
  func.func @transform_0(%arg0: i32) -> (i32, i32) {
    %c0_i32 = arith.constant 0 : i32
    %c0_i32_0 = arith.constant 0 : i32
    return %arg0, %c0_i32 : i32, i32
  }
  func.func @transform_1(%arg0: i32) -> (i32, i32) {
    %c0_i32 = arith.constant 0 : i32
    %c0_i32_0 = arith.constant 0 : i32
    %c0_i32_1 = arith.constant 0 : i32
    return %c0_i32, %c0_i32_0 : i32, i32
  }
  func.func @transform_2(%arg0: i32) -> (i32, i32) {
    %c0_i32 = arith.constant 0 : i32
    %c0_i32_0 = arith.constant 0 : i32
    %c0_i32_1 = arith.constant 0 : i32
    return %c0_i32, %c0_i32_0 : i32, i32
  }
  func.func @transform_3(%arg0: i32) -> (i32, i32) {
    %c0_i32 = arith.constant 0 : i32
    %c0_i32_0 = arith.constant 0 : i32
    %c0_i32_1 = arith.constant 0 : i32
    return %c0_i32, %c0_i32_0 : i32, i32
  }
  func.func @transform_4(%arg0: i32) -> (i32, i32) {
    %c0_i32 = arith.constant 0 : i32
    %c0_i32_0 = arith.constant 0 : i32
    %c0_i32_1 = arith.constant 0 : i32
    return %c0_i32, %c0_i32_0 : i32, i32
  }
  func.func @transform_5(%arg0: i32) -> (i32, i32) {
    %c0_i32 = arith.constant 0 : i32
    %c0_i32_0 = arith.constant 0 : i32
    %c0_i32_1 = arith.constant 0 : i32
    return %c0_i32, %c0_i32_0 : i32, i32
  }
  func.func @transform_6(%arg0: i32) -> (i32, i32) {
    %c0_i32 = arith.constant 0 : i32
    %c0_i32_0 = arith.constant 0 : i32
    %c0_i32_1 = arith.constant 0 : i32
    return %c0_i32, %c0_i32_0 : i32, i32
  }
  func.func @transform_7(%arg0: i32) -> (i32, i32) {
    %c0_i32 = arith.constant 0 : i32
    %c0_i32_0 = arith.constant 0 : i32
    return %arg0, %c0_i32 : i32, i32
  }
}

module attributes {stable_mosaic.version = 11 : i64} {
  func.func @kernel(%arg0: i32, %arg1: memref<8x16xf32, #tpu.memory_space<vmem>>, %arg2: memref<16x32xbf16, #tpu.memory_space<vmem>>, %arg3: memref<1x32xf32, #tpu.memory_space<vmem>>, %arg4: memref<32x32xbf16, #tpu.memory_space<vmem>>, %arg5: memref<1x32xf32, #tpu.memory_space<vmem>>, %arg6: memref<1x32xf32, #tpu.memory_space<vmem>>, %arg7: memref<1x1xf32, #tpu.memory_space<vmem>>, %arg8: memref<8x1xf32, #tpu.memory_space<vmem>>) attributes {dimension_semantics = [#tpu.dimension_semantics<parallel>], iteration_bounds = array<i64: 1>, scalar_prefetch = 0 : i64, scratch_operands = 0 : i64, tpu.core_type = #tpu.core_type<tc>, window_params = [{transform_indices = @transform_0, window_bounds = array<i64: 8, 16>}, {pipeline_mode = #tpu.pipeline_mode<synchronous>, transform_indices = @transform_1, window_bounds = array<i64: 16, 32>}, {pipeline_mode = #tpu.pipeline_mode<synchronous>, transform_indices = @transform_2, window_bounds = array<i64: 1, 32>}, {pipeline_mode = #tpu.pipeline_mode<synchronous>, transform_indices = @transform_3, window_bounds = array<i64: 32, 32>}, {pipeline_mode = #tpu.pipeline_mode<synchronous>, transform_indices = @transform_4, window_bounds = array<i64: 1, 32>}, {pipeline_mode = #tpu.pipeline_mode<synchronous>, transform_indices = @transform_5, window_bounds = array<i64: 1, 32>}, {pipeline_mode = #tpu.pipeline_mode<synchronous>, transform_indices = @transform_6, window_bounds = array<i64: 1, 1>}, {transform_indices = @transform_7, window_bounds = array<i64: 8, 1>}]} {
    %c0 = arith.constant 0 : index
    %c0_0 = arith.constant 0 : index
    %0 = vector.load %arg1[%c0, %c0_0] : memref<8x16xf32, #tpu.memory_space<vmem>>, vector<8x16xf32>
    %c0_1 = arith.constant 0 : index
    %c0_2 = arith.constant 0 : index
    %1 = vector.load %arg2[%c0_1, %c0_2] : memref<16x32xbf16, #tpu.memory_space<vmem>>, vector<16x32xbf16>
    %c0_3 = arith.constant 0 : index
    %c0_4 = arith.constant 0 : index
    %2 = vector.load %arg3[%c0_3, %c0_4] : memref<1x32xf32, #tpu.memory_space<vmem>>, vector<1x32xf32>
    %3 = arith.truncf %0 : vector<8x16xf32> to vector<8x16xbf16>
    %cst = arith.constant dense<0.000000e+00> : vector<8x32xf32>
    %4 = tpu.matmul %3, %1, %cst {dimension_numbers = #tpu.dot_dimension_numbers<[1], [0], [0], [1], [0, 0, 1, 1], [], []>} : vector<8x16xbf16>, vector<16x32xbf16>, vector<8x32xf32> -> vector<8x32xf32>
    %5 = vector.broadcast %2 : vector<1x32xf32> to vector<8x32xf32>
    %6 = arith.addf %4, %5 : vector<8x32xf32>
    %cst_5 = arith.constant 0.000000e+00 : f32
    %7 = vector.broadcast %cst_5 : f32 to vector<8x32xf32>
    %8 = arith.cmpf ogt, %6, %7 : vector<8x32xf32>
    %cst_6 = arith.constant 2.000000e-01 : f32
    %9 = vector.broadcast %cst_6 : f32 to vector<8x32xf32>
    %10 = arith.mulf %9, %6 : vector<8x32xf32>
    %11 = arith.select %8, %6, %10 : vector<8x32xi1>, vector<8x32xf32>
    %c0_7 = arith.constant 0 : index
    %c0_8 = arith.constant 0 : index
    %12 = vector.load %arg4[%c0_7, %c0_8] : memref<32x32xbf16, #tpu.memory_space<vmem>>, vector<32x32xbf16>
    %c0_9 = arith.constant 0 : index
    %c0_10 = arith.constant 0 : index
    %13 = vector.load %arg5[%c0_9, %c0_10] : memref<1x32xf32, #tpu.memory_space<vmem>>, vector<1x32xf32>
    %14 = arith.truncf %11 : vector<8x32xf32> to vector<8x32xbf16>
    %cst_11 = arith.constant dense<0.000000e+00> : vector<8x32xf32>
    %15 = tpu.matmul %14, %12, %cst_11 {dimension_numbers = #tpu.dot_dimension_numbers<[1], [0], [0], [1], [0, 0, 1, 1], [], []>} : vector<8x32xbf16>, vector<32x32xbf16>, vector<8x32xf32> -> vector<8x32xf32>
    %16 = vector.broadcast %13 : vector<1x32xf32> to vector<8x32xf32>
    %17 = arith.addf %15, %16 : vector<8x32xf32>
    %cst_12 = arith.constant 0.000000e+00 : f32
    %18 = vector.broadcast %cst_12 : f32 to vector<8x32xf32>
    %19 = arith.cmpf ogt, %17, %18 : vector<8x32xf32>
    %cst_13 = arith.constant 2.000000e-01 : f32
    %20 = vector.broadcast %cst_13 : f32 to vector<8x32xf32>
    %21 = arith.mulf %20, %17 : vector<8x32xf32>
    %22 = arith.select %19, %17, %21 : vector<8x32xi1>, vector<8x32xf32>
    %c0_14 = arith.constant 0 : index
    %c0_15 = arith.constant 0 : index
    %23 = vector.load %arg6[%c0_14, %c0_15] : memref<1x32xf32, #tpu.memory_space<vmem>>, vector<1x32xf32>
    %c0_16 = arith.constant 0 : index
    %c0_17 = arith.constant 0 : index
    %24 = vector.load %arg7[%c0_16, %c0_17] : memref<1x1xf32, #tpu.memory_space<vmem>>, vector<1x1xf32>
    %25 = vector.broadcast %23 : vector<1x32xf32> to vector<8x32xf32>
    %26 = arith.mulf %22, %25 : vector<8x32xf32>
    %cst_18 = arith.constant dense<0.000000e+00> : vector<8xf32>
    %27 = vector.multi_reduction <add>, %26, %cst_18 [1] : vector<8x32xf32> to vector<8xf32>
    %28 = vector.shape_cast %27 : vector<8xf32> to vector<8x1xf32>
    %29 = vector.broadcast %24 : vector<1x1xf32> to vector<8x1xf32>
    %30 = arith.addf %28, %29 : vector<8x1xf32>
    %31 = arith.negf %30 : vector<8x1xf32>
    %32 = math.exp %31 : vector<8x1xf32>
    %cst_19 = arith.constant 1.000000e+00 : f32
    %33 = vector.broadcast %cst_19 : f32 to vector<8x1xf32>
    %34 = arith.addf %33, %32 : vector<8x1xf32>
    %35 = arith.divf %33, %34 : vector<8x1xf32>
    %c0_20 = arith.constant 0 : index
    %c0_21 = arith.constant 0 : index
    %36 = vector.load %arg8[%c0_20, %c0_21] : memref<8x1xf32, #tpu.memory_space<vmem>>, vector<8x1xf32>
    tpu.vector_store %arg8[%c0_20, %c0_21], %35 {strides = array<i32>} : memref<8x1xf32, #tpu.memory_space<vmem>>, vector<8x1xf32>,
    return
  }
  func.func @transform_0(%arg0: i32) -> (i32, i32) {
    %c0_i32 = arith.constant 0 : i32
    %c0_i32_0 = arith.constant 0 : i32
    return %arg0, %c0_i32 : i32, i32
  }
  func.func @transform_1(%arg0: i32) -> (i32, i32) {
    %c0_i32 = arith.constant 0 : i32
    %c0_i32_0 = arith.constant 0 : i32
    %c0_i32_1 = arith.constant 0 : i32
    return %c0_i32, %c0_i32_0 : i32, i32
  }
  func.func @transform_2(%arg0: i32) -> (i32, i32) {
    %c0_i32 = arith.constant 0 : i32
    %c0_i32_0 = arith.constant 0 : i32
    %c0_i32_1 = arith.constant 0 : i32
    return %c0_i32, %c0_i32_0 : i32, i32
  }
  func.func @transform_3(%arg0: i32) -> (i32, i32) {
    %c0_i32 = arith.constant 0 : i32
    %c0_i32_0 = arith.constant 0 : i32
    %c0_i32_1 = arith.constant 0 : i32
    return %c0_i32, %c0_i32_0 : i32, i32
  }
  func.func @transform_4(%arg0: i32) -> (i32, i32) {
    %c0_i32 = arith.constant 0 : i32
    %c0_i32_0 = arith.constant 0 : i32
    %c0_i32_1 = arith.constant 0 : i32
    return %c0_i32, %c0_i32_0 : i32, i32
  }
  func.func @transform_5(%arg0: i32) -> (i32, i32) {
    %c0_i32 = arith.constant 0 : i32
    %c0_i32_0 = arith.constant 0 : i32
    %c0_i32_1 = arith.constant 0 : i32
    return %c0_i32, %c0_i32_0 : i32, i32
  }
  func.func @transform_6(%arg0: i32) -> (i32, i32) {
    %c0_i32 = arith.constant 0 : i32
    %c0_i32_0 = arith.constant 0 : i32
    %c0_i32_1 = arith.constant 0 : i32
    return %c0_i32, %c0_i32_0 : i32, i32
  }
  func.func @transform_7(%arg0: i32) -> (i32, i32) {
    %c0_i32 = arith.constant 0 : i32
    %c0_i32_0 = arith.constant 0 : i32
    return %arg0, %c0_i32 : i32, i32
  }
}

</mosaic_0001>

<bundles_post_ra>
// kernel: tpu_custom_call.1
= control target key start
LH: loop header
LB: loop body
LE: loop exit
PB: predicated region body
PF: predicated region fallthrough
CT: control target
= control target key end

     0   :  { %s365_s0 = inlined_call_operand.hbm [shape: f32[8,16], index: 0, kind: input, shape index: {}]   ;;  %s366_s1 = inlined_call_operand.hbm [shape: bf16[16,32], index: 1, kind: input, shape index: {}]   ;;  %s367_s2 = inlined_call_operand.vmem [shape: f32[1,32], index: 2, kind: input, shape index: {}]   ;;  %s368_s3 = inlined_call_operand.hbm [shape: bf16[32,32], index: 3, kind: input, shape index: {}]   ;;  %s369_s4 = inlined_call_operand.vmem [shape: f32[1,32], index: 4, kind: input, shape index: {}]   ;;  %s370_s5 = inlined_call_operand.vmem [shape: f32[1,32], index: 5, kind: input, shape index: {}]   ;;  %s371_s6 = inlined_call_operand.<no memory space> [shape: f32[1,1], index: 6, kind: input, shape index: {}]   ;;  %s372_s7 = inlined_call_operand.vmem [shape: f32[8,1], index: 7, kind: output, shape index: {}]  }
   0x1   :  { %v12_v0 = vstv %s371_s6 }
   0x2   :  { %13 = vst [vmem:[#allocation2] sm:$0x1] %v12_v0 }
   0x3   :  { %14 = vsyncpa [#allocation4], 0 }
   0x4   :  { %15 = vsyncpa [#allocation6], 0  ;;  %s31_s28 = sshll.u32 %s366_s1, 4  ;;  %s296_s29 = smov [#allocation5]   ;;  %s32_s28 = int_to_ptr.hbm [resolvable:$true] %s31_s28 }
   0x5   :  { %s33_s30 = sshll.u32 %s296_s29, 4  ;;  %s21_s10 = sshll.u32 %s365_s0, 4  ;;  %s34_s30 = int_to_ptr.vmem [resolvable:$true] %s33_s30  ;;  %s22_s10 = int_to_ptr.hbm [resolvable:$true] %s21_s10 }
   0x6   :  { %s297_s11 = smov 64   ;;  %s298_s12 = smov 4  }
   0x7   :  { %39 = dma.hbm_to_vmem [thread:$0]  %s32_s28, 128, %s34_s30, [#allocation6], %s297_s11, %s297_s11, %s298_s12  }
   0x8   :  { %s299_s6 = smov [#allocation3]   ;;  %s46_s16 = sshll.u32 %s368_s3, 4  ;;  %s47_s16 = int_to_ptr.hbm [resolvable:$true] %s46_s16 }
   0x9   :  { %s23_s13 = sshll.u32 %s299_s6, 4  ;;  %s300_s1 = smov [#allocation7]   ;;  %s24_s13 = int_to_ptr.vmem [resolvable:$true] %s23_s13 }
   0xa   :  { %26 = dma.hbm_to_vmem [thread:$0]  %s22_s10, 128, %s24_s13, [#allocation4]  }
   0xb   :  { %s48_s17 = sshll.u32 %s300_s1, 4  ;;  %s49_s17 = int_to_ptr.vmem [resolvable:$true] %s48_s17 }
   0xc   :  { %54 = dma.hbm_to_vmem [thread:$0]  %s47_s16, 256, %s49_s17, [#allocation6], %s297_s11, %s297_s11, %s298_s12  }
   0xd   :  { %292 = dma.done.wait [#allocation4], 128  }
   0xe   :  { %293 = vsyncadd [#allocation4], 4294967168 }
   0xf   :  { %294 = dma.done.wait [#allocation6], 384  }
  0x10   :  { %295 = vsyncadd [#allocation6], 4294966912  ;;  %v204_v1 = vld [vmem:[#allocation5] sm:$0xff]  ;;  %v74_v2 = vld [vmem:[#allocation3] sm:$0xff]  ;;  %vm88_vm0 = vcmask 130048   ;;  %vm129_vm2 = vcmask 261120  }
  0x11   :  { %v78_v3 = vpack.c.bf16 %v74_v2, %v74_v2  ;;  %99 = vmatpush.bf16.msra.mxu0 %v204_v1  ;;  %v206_v4 = vld [vmem:[#allocation7 + $0x8] sm:$0xff]  ;;  %v205_v5 = vld [vmem:[#allocation7] sm:$0xff]  ;;  %vm181_vm7 = vcmask 7168  }
  0x12   :  { %139 = vmatpush.bf16.msra.mxu1 %v206_v4  ;;  %v212_v6 = vld [vmem:[%s367_s2] ss:$0 sm:$0xff] }
  0x13   :  { %v213_v13 = vld [vmem:[%s369_s4] ss:$0 sm:$0xff] }
  0x14   :  { %193 = vmatmul.msk.bf16.vlgmr.msra.gmra.mxu0 %vm88_vm0, %v78_v3  ;;  %v214_v16 = vld [vmem:[%s370_s5] ss:$0 sm:$0xff] }
  0x15   :  { %v215_v22 = vld [vmem:[#allocation2] ss:$0 sm:$0xff] }
  0x16   :  { %140 = vmatpush.bf16.msra.mxu1 %v205_v5 }
  0x91   :  { %v101_v7 = vpop.f32.mrf.mxu0 }
  0x92   :  { %v102_v8 = vadd.f32 %v212_v6, %v101_v7 }
  0x94   :  { %vm105_vm1 = vcmp.gt.f32.partialorder %v102_v8, 0.0  ;;  %v106_v9 = vmul.f32 0.2, %v102_v8 }
  0x96   :  { %v107_v10 = vsel %vm105_vm1, %v102_v8, %v106_v9 }
  0x97   :  { %v113_v11 = vpack.c.bf16 %v107_v10, %v107_v10 }
  0x99   :  { %v103_v12 = vpop.f32.mrf.mxu0  ;;  %202 = vmatmul.msk.bf16.vlgmr.msra.gmra.mxu1 %vm129_vm2, %v113_v11 }
 0x116   :  { %v142_v14 = vpop.f32.mrf.mxu1 }
 0x117   :  { %v143_v15 = vadd.f32 %v213_v13, %v142_v14 }
 0x119   :  { %v147_v17 = vmul.f32 0.2, %v143_v15  ;;  %vm146_vm3 = vcmp.gt.f32.partialorder %v143_v15, 0.0 }
 0x11b   :  { %v148_v18 = vsel %vm146_vm3, %v143_v15, %v147_v17 }
 0x11c   :  { %v154_v19 = vmul.f32 %v214_v16, %v148_v18 }
 0x11e   :  { %v144_v20 = vpop.f32.mrf.mxu1  ;;  %v155_v21 = vsel %vm129_vm2, %v154_v19, 0.0 }
 0x11f   :  { %156 = vadd.xlane.f32.xlu0 %v155_v21 }
 0x192   :  { %v157_v23 = vpop.xlane.xlu0 %156 }
 0x193   :  { %v161_v24 = vadd.f32 %v215_v22, %v157_v23 }
 0x195   :  { %v203_v25 = vmul.f32 -1.442695, %v161_v24 }
 0x197   :  { %216 = vpow2.f32 %v203_v25 }
 0x19d   :  { %v217_v26 = vpop.eup %216 }
 0x19e   :  { %v165_v27 = vadd.f32 1.0, %v217_v26 }
 0x1a0   :  { %218 = vrcp.f32 %v165_v27  ;;  %v177_v31 = vand.u32 2147483648, %v165_v27  ;;  %v175_v33 = vand.u32 2147483647, %v165_v27  ;;  %vm171_vm5 = vweird.f32 %v165_v27 }
 0x1a2   :  { %v178_v35 = vor.u32 1.1754944e-38, %v177_v31  ;;  %vm176_vm8 = vcmp.eq.f32.partialorder %v175_v33, 8.507059e+37 }
 0x1a6   :  { %v219_v28 = vpop.eup %218 }
 0x1a7   :  { %v167_v29 = vmul.f32 %v219_v28, %v165_v27  ;;  %vm172_vm4 = vweird.f32 %v219_v28 }
 0x1a8   :  { %vm173_vm6 = vmor %vm171_vm5, %vm172_vm4 }
 0x1a9   :  { %v168_v30 = vsub.f32 1.0, %v167_v29 }
 0x1ab   :  { %v169_v32 = vmul.f32 %v219_v28, %v168_v30 }
 0x1ad   :  { %v170_v34 = vadd.f32 %v219_v28, %v169_v32 }
 0x1af   :  { %v174_v36 = vsel %vm173_vm6, %v219_v28, %v170_v34 }
 0x1b0   :  { %v179_v37 = vsel %vm176_vm8, %v178_v35, %v174_v36 }
 0x1b1   :  { %182 = vst.msk [vmem:[%s372_s7] sm:$0xff] %vm181_vm7, %v179_v37 }
 0x1b2   :  { %187 = vsyncpa [#allocation4], 1 }
 0x1b3   :  { %188 = vsyncpa [#allocation6], 1 }

// kernel: tpu_custom_call.1
= control target key start
LH: loop header
LB: loop body
LE: loop exit
PB: predicated region body
PF: predicated region fallthrough
CT: control target
= control target key end

     0   :  { %s365_s0 = inlined_call_operand.hbm [shape: f32[8,16], index: 0, kind: input, shape index: {}]   ;;  %s366_s1 = inlined_call_operand.hbm [shape: bf16[16,32], index: 1, kind: input, shape index: {}]   ;;  %s367_s2 = inlined_call_operand.vmem [shape: f32[1,32], index: 2, kind: input, shape index: {}]   ;;  %s368_s3 = inlined_call_operand.hbm [shape: bf16[32,32], index: 3, kind: input, shape index: {}]   ;;  %s369_s4 = inlined_call_operand.vmem [shape: f32[1,32], index: 4, kind: input, shape index: {}]   ;;  %s370_s5 = inlined_call_operand.vmem [shape: f32[1,32], index: 5, kind: input, shape index: {}]   ;;  %s371_s6 = inlined_call_operand.<no memory space> [shape: f32[1,1], index: 6, kind: input, shape index: {}]   ;;  %s372_s7 = inlined_call_operand.vmem [shape: f32[8,1], index: 7, kind: output, shape index: {}]  }
   0x1   :  { %v12_v0 = vstv %s371_s6 }
   0x2   :  { %13 = vst [vmem:[#allocation2] sm:$0x1] %v12_v0 }
   0x3   :  { %14 = vsyncpa [#allocation4], 0 }
   0x4   :  { %15 = vsyncpa [#allocation6], 0  ;;  %s31_s28 = sshll.u32 %s366_s1, 4  ;;  %s296_s29 = smov [#allocation5]   ;;  %s32_s28 = int_to_ptr.hbm [resolvable:$true] %s31_s28 }
   0x5   :  { %s33_s30 = sshll.u32 %s296_s29, 4  ;;  %s21_s10 = sshll.u32 %s365_s0, 4  ;;  %s34_s30 = int_to_ptr.vmem [resolvable:$true] %s33_s30  ;;  %s22_s10 = int_to_ptr.hbm [resolvable:$true] %s21_s10 }
   0x6   :  { %s297_s11 = smov 64   ;;  %s298_s12 = smov 4  }
   0x7   :  { %39 = dma.hbm_to_vmem [thread:$0]  %s32_s28, 128, %s34_s30, [#allocation6], %s297_s11, %s297_s11, %s298_s12  }
   0x8   :  { %s299_s6 = smov [#allocation3]   ;;  %s46_s16 = sshll.u32 %s368_s3, 4  ;;  %s47_s16 = int_to_ptr.hbm [resolvable:$true] %s46_s16 }
   0x9   :  { %s23_s13 = sshll.u32 %s299_s6, 4  ;;  %s300_s1 = smov [#allocation7]   ;;  %s24_s13 = int_to_ptr.vmem [resolvable:$true] %s23_s13 }
   0xa   :  { %26 = dma.hbm_to_vmem [thread:$0]  %s22_s10, 128, %s24_s13, [#allocation4]  }
   0xb   :  { %s48_s17 = sshll.u32 %s300_s1, 4  ;;  %s49_s17 = int_to_ptr.vmem [resolvable:$true] %s48_s17 }
   0xc   :  { %54 = dma.hbm_to_vmem [thread:$0]  %s47_s16, 256, %s49_s17, [#allocation6], %s297_s11, %s297_s11, %s298_s12  }
   0xd   :  { %292 = dma.done.wait [#allocation4], 128  }
   0xe   :  { %293 = vsyncadd [#allocation4], 4294967168 }
   0xf   :  { %294 = dma.done.wait [#allocation6], 384  }
  0x10   :  { %295 = vsyncadd [#allocation6], 4294966912  ;;  %v204_v1 = vld [vmem:[#allocation5] sm:$0xff]  ;;  %v74_v2 = vld [vmem:[#allocation3] sm:$0xff]  ;;  %vm88_vm0 = vcmask 130048   ;;  %vm129_vm2 = vcmask 261120  }
  0x11   :  { %v78_v3 = vpack.c.bf16 %v74_v2, %v74_v2  ;;  %99 = vmatpush.bf16.msra.mxu0 %v204_v1  ;;  %v206_v4 = vld [vmem:[#allocation7 + $0x8] sm:$0xff]  ;;  %v205_v5 = vld [vmem:[#allocation7] sm:$0xff]  ;;  %vm181_vm7 = vcmask 7168  }
  0x12   :  { %139 = vmatpush.bf16.msra.mxu1 %v206_v4  ;;  %v212_v6 = vld [vmem:[%s367_s2] ss:$0 sm:$0xff] }
  0x13   :  { %v213_v13 = vld [vmem:[%s369_s4] ss:$0 sm:$0xff] }
  0x14   :  { %193 = vmatmul.msk.bf16.vlgmr.msra.gmra.mxu0 %vm88_vm0, %v78_v3  ;;  %v214_v16 = vld [vmem:[%s370_s5] ss:$0 sm:$0xff] }
  0x15   :  { %v215_v22 = vld [vmem:[#allocation2] ss:$0 sm:$0xff] }
  0x16   :  { %140 = vmatpush.bf16.msra.mxu1 %v205_v5 }
  0x91   :  { %v101_v7 = vpop.f32.mrf.mxu0 }
  0x92   :  { %v102_v8 = vadd.f32 %v212_v6, %v101_v7 }
  0x94   :  { %vm105_vm1 = vcmp.gt.f32.partialorder %v102_v8, 0.0  ;;  %v106_v9 = vmul.f32 0.2, %v102_v8 }
  0x96   :  { %v107_v10 = vsel %vm105_vm1, %v102_v8, %v106_v9 }
  0x97   :  { %v113_v11 = vpack.c.bf16 %v107_v10, %v107_v10 }
  0x99   :  { %v103_v12 = vpop.f32.mrf.mxu0  ;;  %202 = vmatmul.msk.bf16.vlgmr.msra.gmra.mxu1 %vm129_vm2, %v113_v11 }
 0x116   :  { %v142_v14 = vpop.f32.mrf.mxu1 }
 0x117   :  { %v143_v15 = vadd.f32 %v213_v13, %v142_v14 }
 0x119   :  { %v147_v17 = vmul.f32 0.2, %v143_v15  ;;  %vm146_vm3 = vcmp.gt.f32.partialorder %v143_v15, 0.0 }
 0x11b   :  { %v148_v18 = vsel %vm146_vm3, %v143_v15, %v147_v17 }
 0x11c   :  { %v154_v19 = vmul.f32 %v214_v16, %v148_v18 }
 0x11e   :  { %v144_v20 = vpop.f32.mrf.mxu1  ;;  %v155_v21 = vsel %vm129_vm2, %v154_v19, 0.0 }
 0x11f   :  { %156 = vadd.xlane.f32.xlu0 %v155_v21 }
 0x192   :  { %v157_v23 = vpop.xlane.xlu0 %156 }
 0x193   :  { %v161_v24 = vadd.f32 %v215_v22, %v157_v23 }
 0x195   :  { %v203_v25 = vmul.f32 -1.442695, %v161_v24 }
 0x197   :  { %216 = vpow2.f32 %v203_v25 }
 0x19d   :  { %v217_v26 = vpop.eup %216 }
 0x19e   :  { %v165_v27 = vadd.f32 1.0, %v217_v26 }
 0x1a0   :  { %218 = vrcp.f32 %v165_v27  ;;  %v177_v31 = vand.u32 2147483648, %v165_v27  ;;  %v175_v33 = vand.u32 2147483647, %v165_v27  ;;  %vm171_vm5 = vweird.f32 %v165_v27 }
 0x1a2   :  { %v178_v35 = vor.u32 1.1754944e-38, %v177_v31  ;;  %vm176_vm8 = vcmp.eq.f32.partialorder %v175_v33, 8.507059e+37 }
 0x1a6   :  { %v219_v28 = vpop.eup %218 }
 0x1a7   :  { %v167_v29 = vmul.f32 %v219_v28, %v165_v27  ;;  %vm172_vm4 = vweird.f32 %v219_v28 }
 0x1a8   :  { %vm173_vm6 = vmor %vm171_vm5, %vm172_vm4 }
 0x1a9   :  { %v168_v30 = vsub.f32 1.0, %v167_v29 }
 0x1ab   :  { %v169_v32 = vmul.f32 %v219_v28, %v168_v30 }
 0x1ad   :  { %v170_v34 = vadd.f32 %v219_v28, %v169_v32 }
 0x1af   :  { %v174_v36 = vsel %vm173_vm6, %v219_v28, %v170_v34 }
 0x1b0   :  { %v179_v37 = vsel %vm176_vm8, %v178_v35, %v174_v36 }
 0x1b1   :  { %182 = vst.msk [vmem:[%s372_s7] sm:$0xff] %vm181_vm7, %v179_v37 }
 0x1b2   :  { %187 = vsyncpa [#allocation4], 1 }
 0x1b3   :  { %188 = vsyncpa [#allocation6], 1 }

</bundles_post_ra>
